<compile_context>
chip_gen: v7x
topology: tpu7x:2x2x1
jax: 0.10.0
libtpu: 0.0.40
codegen_flags: <defaults>
</compile_context>

<pallas_src>
import math

import jax
import jax.numpy as jnp
from jax.experimental import pallas as pl
from jax.experimental.pallas import tpu as pltpu


def _round_up(n, m):
    return ((n + m - 1) // m) * m


# ---------------------------------------------------------------------------
# One-time parameter packing (hoisted out of the hot path).
# ---------------------------------------------------------------------------
def pack_projection(weight, bias, *, operand_dtype=jnp.bfloat16):
    """nn.Linear params -> MXU-friendly layout (do this once, not per forward).

    weight: (emb_size, n_freq) -> w_fe: (F_pack, E_pad); zero padding rows/cols
            keep the contraction exact.
    bias:   (emb_size,)        -> b_row: (1, E_pad) float32 (f32 bias add).

    operand_dtype=bf16 (default) feeds the MXU with native bf16 operands on
    v5e/v6e/v7x while accumulation stays f32; use jnp.float32 for a
    full-precision validation path.
    """
    E, F = weight.shape
    dt = operand_dtype if operand_dtype is not None else weight.dtype
    F_pack = _round_up(F, 128)
    E_pad = _round_up(E, 128)
    w_fe = jnp.zeros((F_pack, E_pad), dt).at[:F, :E].set(weight.T.astype(dt))
    b_row = jnp.zeros((1, E_pad), jnp.float32).at[0, :E].set(bias.astype(jnp.float32))
    return w_fe, b_row, E


# ---------------------------------------------------------------------------
# Kernels.
# ---------------------------------------------------------------------------
def _make_time_tiled_kernel(n_freq):
    """General path: grid=(batch, time-tiles); permute fused via TN dot_general."""

    def kernel(x_ref, w_ref, b_ref, o_ref):
        # x_ref: (1, F, TB)   w_ref: (F_pack, E_pad)   b_ref: (1, E_pad) f32
        # o_ref: (1, TB, E_pad)
        x_ft = x_ref[0].astype(w_ref.dtype)          # in-VMEM cast to MXU operand dtype
        w = w_ref[...] if n_freq == w_ref.shape[0] else w_ref[0:n_freq, :]
        # Contract the freq axis directly (lhs dim 0 <-> rhs dim 0): the
        # permute(0,2,1) is folded into the MXU feed — no materialized transpose.
        acc = jax.lax.dot_general(
            x_ft, w, dimension_numbers=(((0,), (0,)), ((), ())),
            preferred_element_type=jnp.float32)      # (TB, E_pad), f32 accumulate
        o_ref[0] = (acc + b_ref[...]).astype(o_ref.dtype)

    return kernel


def _batch_merged_kernel(x_ref, w_ref, b_ref, o_ref):
    """Small-T path: b_block batches per step, collapsed into the MXU M dim."""
    # x_ref: (BB, F_pack, T)  (freq zero-padded to match zero W rows -> exact)
    # w_ref: (F_pack, E_pad)  b_ref: (1, E_pad) f32   o_ref: (BB, T, E_pad)
    bb, _, t = x_ref.shape
    rows = [x_ref[i].astype(w_ref.dtype).T for i in range(bb)]   # (T, F_pack) each
    x_m = rows[0] if bb == 1 else jnp.concatenate(rows, axis=0)  # (BB*T, F_pack)
    acc = jnp.dot(x_m, w_ref[...], preferred_element_type=jnp.float32)
    acc = acc + b_ref[...]                                       # f32 bias add
    for i in range(bb):
        o_ref[i] = acc[i * t:(i + 1) * t].astype(o_ref.dtype)


# ---------------------------------------------------------------------------
# Wrapper.
# ---------------------------------------------------------------------------
def _vmem_estimate(x_blk_elems, out_blk_elems, w_elems, in_b, w_b, out_b):
    return (2 * (x_blk_elems * in_b + out_blk_elems * out_b)   # double-buffered blocks
            + out_blk_elems * 4                                # f32 accumulator
            + w_elems * w_b + 4 * 128)                         # resident weight + bias


def patch_frequency_embedding(x, w_fe, b_row, *, emb_size=None,
                              t_block_max=1024, b_block_max=8,
                              out_dtype=None, vmem_budget_bytes=12 * 2 ** 20,
                              x_buffer_count=2):
    """x: (B, F, T) -> (B, T, emb_size). w_fe/b_row come from pack_projection."""
    B, F, T = x.shape
    F_pack, E_pad = w_fe.shape
    E = int(emb_size) if emb_size is not None else E_pad
    out_dtype = out_dtype or x.dtype
    in_b = jnp.dtype(x.dtype).itemsize
    w_b = jnp.dtype(w_fe.dtype).itemsize
    out_b = jnp.dtype(out_dtype).itemsize

    cost = pl.CostEstimate(
        flops=2 * B * T * F * E_pad, transcendentals=0,
        bytes_accessed=(B * F * T * in_b + F_pack * E_pad * w_b
                        + E_pad * 4 + B * T * E_pad * out_b))

    use_batch_merge = (T < 128) and (B > 1) and (T % 8 == 0)

    if use_batch_merge:
        # Small-T regime (module default T=16): merge b_block batches into the
        # MXU M dimension and cut the grid-step count by b_block.
        b_block = max(1, min(B, b_block_max, max(1, 256 // T)))
        nb = pl.cdiv(B, b_block)
        # x is tiny here (bandwidth irrelevant); zero-pad freq to F_pack so the
        # in-kernel (F_pack, T) transposes / sublane concat stay (8,128)-aligned.
        x_in = x if F_pack == F else jnp.pad(x, ((0, 0), (0, F_pack - F), (0, 0)))
        est = _vmem_estimate(b_block * F_pack * T, b_block * T * E_pad,
                             F_pack * E_pad, in_b, w_b, out_b)
        vmem_limit = int(min(48 * 2 ** 20, max(16 * 2 ** 20, 2 * est)))
        out = pl.pallas_call(
            _batch_merged_kernel,
            out_shape=jax.ShapeDtypeStruct((B, T, E_pad), out_dtype),
            grid_spec=pltpu.PrefetchScalarGridSpec(
                num_scalar_prefetch=0, grid=(nb,),
                in_specs=[pl.BlockSpec((b_block, F_pack, T), lambda i: (i, 0, 0)),
                          pl.BlockSpec((F_pack, E_pad), lambda i: (0, 0)),
                          pl.BlockSpec((1, E_pad), lambda i: (0, 0))],
                out_specs=pl.BlockSpec((b_block, T, E_pad), lambda i: (i, 0, 0))),
            compiler_params=pltpu.CompilerParams(
                dimension_semantics=("parallel",), vmem_limit_bytes=vmem_limit),
            cost_estimate=cost,
        )(x_in, w_fe, b_row)
    else:
        # General / large-T path: no pad, no cast, no post-slice of x in HBM.
        if T <= t_block_max:
            t_block = T                                   # single full-extent block
        else:
            t_block = max(128, (t_block_max // 128) * 128)  # always a 128-multiple
            while t_block > 128 and _vmem_estimate(
                    F * t_block, t_block * E_pad, F_pack * E_pad,
                    in_b, w_b, out_b) > vmem_budget_bytes:
                t_block -= 128                            # v7x-safe VMEM budget
        n_t = pl.cdiv(T, t_block)          # ragged tail handled by Pallas masking
        est = _vmem_estimate(F * t_block, t_block * E_pad, F_pack * E_pad,
                             in_b, w_b, out_b)
        vmem_limit = int(min(48 * 2 ** 20, max(16 * 2 ** 20, 2 * est)))
        if x_buffer_count == 2:
            x_spec = pl.BlockSpec((1, F, t_block), lambda b, t: (b, 0, t))
        else:                               # deepen buffering if DMA still exposed
            x_spec = pl.BlockSpec((1, F, t_block), lambda b, t: (b, 0, t),
                                  pipeline_mode=pl.Buffered(x_buffer_count))
        out = pl.pallas_call(
            _make_time_tiled_kernel(F),
            out_shape=jax.ShapeDtypeStruct((B, T, E_pad), out_dtype),
            grid_spec=pltpu.PrefetchScalarGridSpec(
                num_scalar_prefetch=0, grid=(B, n_t),
                in_specs=[x_spec,
                          pl.BlockSpec((F_pack, E_pad), lambda b, t: (0, 0)),
                          pl.BlockSpec((1, E_pad), lambda b, t: (0, 0))],
                out_specs=pl.BlockSpec((1, t_block, E_pad), lambda b, t: (b, t, 0))),
            compiler_params=pltpu.CompilerParams(
                dimension_semantics=("parallel", "parallel"),
                vmem_limit_bytes=vmem_limit),
            cost_estimate=cost,
        )(x, w_fe, b_row)

    # No-op when emb_size is already 128-aligned (default 256) -> no output copy.
    return out if E == E_pad else out[..., :E]


def patch_frequency_embedding_ref(x, weight, bias):
    """Pure-JAX reference mirroring the PyTorch forward (permute + Linear)."""
    x_t = jnp.transpose(x, (0, 2, 1))                          # (B, T, F)
    return jnp.einsum("btf,ef->bte", x_t, weight,
                      precision=jax.lax.Precision.HIGHEST) + bias


if __name__ == "__main__":
    # Module defaults: n_freq=101, emb_size=256; small batch/time.
    B, F, T, E = 2, 101, 16, 256

    key = jax.random.PRNGKey(0)
    kx, kw, kb, kx2 = jax.random.split(key, 4)

    x = jax.random.normal(kx, (B, F, T), dtype=jnp.float32)
    bound = 1.0 / math.sqrt(F)  # nn.Linear default init range
    W = jax.random.uniform(kw, (E, F), minval=-bound, maxval=bound, dtype=jnp.float32)
    b = jax.random.uniform(kb, (E,), minval=-bound, maxval=bound, dtype=jnp.float32)

    ref = patch_frequency_embedding_ref(x, W, b)

    # Default path: bf16 MXU operands (f32 accumulate), batch-merged small-T kernel.
    w_bf16, b_row, emb = pack_projection(W, b, operand_dtype=jnp.bfloat16)
    out = jax.block_until_ready(
        patch_frequency_embedding(x, w_bf16, b_row, emb_size=emb))
    assert out.shape == (B, T, E)
    assert jnp.allclose(out, ref, atol=2e-2, rtol=2e-2)

    # Full-precision (f32-operand) validation path.
    w_f32, b_row32, _ = pack_projection(W, b, operand_dtype=jnp.float32)
    out32 = jax.block_until_ready(
        patch_frequency_embedding(x, w_f32, b_row32, emb_size=emb))
    assert out32.shape == (B, T, E)
    assert jnp.allclose(out32, ref, atol=1e-3, rtol=1e-3)

    # Larger T exercises the time-tiled path (grid=(B, n_t), fused-permute dot_general).
    T2 = 512
    x2 = jax.random.normal(kx2, (B, F, T2), dtype=jnp.float32)
    ref2 = patch_frequency_embedding_ref(x2, W, b)
    out2 = jax.block_until_ready(
        patch_frequency_embedding(x2, w_bf16, b_row, emb_size=emb, t_block_max=256))
    assert out2.shape == (B, T2, E)
    assert jnp.allclose(out2, ref2, atol=2e-2, rtol=2e-2)

    print("KERNEL_OK")
</pallas_src>

<mosaic_0001>
module attributes {stable_mosaic.version = 11 : i64} {
  func.func @_batch_merged_kernel(%arg0: i32, %arg1: memref<2x128x16xf32, #tpu.memory_space<vmem>>, %arg2: memref<128x256xbf16, #tpu.memory_space<vmem>>, %arg3: memref<1x256xf32, #tpu.memory_space<vmem>>, %arg4: memref<2x16x256xf32, #tpu.memory_space<vmem>>) attributes {dimension_semantics = [#tpu.dimension_semantics<parallel>], iteration_bounds = array<i64: 1>, scalar_prefetch = 0 : i64, scratch_operands = 0 : i64, tpu.core_type = #tpu.core_type<tc>, window_params = [{transform_indices = @transform_0, window_bounds = array<i64: 2, 128, 16>}, {pipeline_mode = #tpu.pipeline_mode<synchronous>, transform_indices = @transform_1, window_bounds = array<i64: 128, 256>}, {pipeline_mode = #tpu.pipeline_mode<synchronous>, transform_indices = @transform_2, window_bounds = array<i64: 1, 256>}, {transform_indices = @transform_3, window_bounds = array<i64: 2, 16, 256>}]} {
    %c0 = arith.constant 0 : index
    %c0_0 = arith.constant 0 : index
    %c0_1 = arith.constant 0 : index
    %0 = vector.load %arg1[%c0, %c0_0, %c0_1] : memref<2x128x16xf32, #tpu.memory_space<vmem>>, vector<1x128x16xf32>
    %1 = vector.shape_cast %0 : vector<1x128x16xf32> to vector<128x16xf32>
    %2 = arith.truncf %1 : vector<128x16xf32> to vector<128x16xbf16>
    %3 = tpu.transpose %2, [1, 0] : vector<128x16xbf16> -> vector<16x128xbf16>
    %c1 = arith.constant 1 : index
    %c0_2 = arith.constant 0 : index
    %c0_3 = arith.constant 0 : index
    %4 = vector.load %arg1[%c1, %c0_2, %c0_3] : memref<2x128x16xf32, #tpu.memory_space<vmem>>, vector<1x128x16xf32>
    %5 = vector.shape_cast %4 : vector<1x128x16xf32> to vector<128x16xf32>
    %6 = arith.truncf %5 : vector<128x16xf32> to vector<128x16xbf16>
    %7 = tpu.transpose %6, [1, 0] : vector<128x16xbf16> -> vector<16x128xbf16>
    %8 = tpu.concatenate %3, %7 in 0 : vector<16x128xbf16>, vector<16x128xbf16> -> vector<32x128xbf16>
    %c0_4 = arith.constant 0 : index
    %c0_5 = arith.constant 0 : index
    %9 = vector.load %arg2[%c0_4, %c0_5] : memref<128x256xbf16, #tpu.memory_space<vmem>>, vector<128x256xbf16>
    %cst = arith.constant dense<0.000000e+00> : vector<32x256xf32>
    %10 = tpu.matmul %8, %9, %cst {dimension_numbers = #tpu.dot_dimension_numbers<[1], [0], [0], [1], [0, 0, 1, 1], [], []>} : vector<32x128xbf16>, vector<128x256xbf16>, vector<32x256xf32> -> vector<32x256xf32>
    %c0_6 = arith.constant 0 : index
    %c0_7 = arith.constant 0 : index
    %11 = vector.load %arg3[%c0_6, %c0_7] : memref<1x256xf32, #tpu.memory_space<vmem>>, vector<1x256xf32>
    %12 = vector.broadcast %11 : vector<1x256xf32> to vector<32x256xf32>
    %13 = arith.addf %10, %12 : vector<32x256xf32>
    %14 = vector.extract_strided_slice %13 {offsets = [0, 0], sizes = [16, 256], strides = [1, 1]} : vector<32x256xf32> to vector<16x256xf32>
    %c0_8 = arith.constant 0 : index
    %c0_9 = arith.constant 0 : index
    %c0_10 = arith.constant 0 : index
    %15 = vector.load %arg4[%c0_8, %c0_9, %c0_10] : memref<2x16x256xf32, #tpu.memory_space<vmem>>, vector<1x16x256xf32>
    %16 = vector.shape_cast %15 : vector<1x16x256xf32> to vector<16x256xf32>
    %17 = vector.shape_cast %14 : vector<16x256xf32> to vector<1x16x256xf32>
    tpu.vector_store %arg4[%c0_8, %c0_9, %c0_10], %17 {strides = array<i32>} : memref<2x16x256xf32, #tpu.memory_space<vmem>>, vector<1x16x256xf32>,
    %18 = vector.extract_strided_slice %13 {offsets = [16, 0], sizes = [16, 256], strides = [1, 1]} : vector<32x256xf32> to vector<16x256xf32>
    %c1_11 = arith.constant 1 : index
    %c0_12 = arith.constant 0 : index
    %c0_13 = arith.constant 0 : index
    %19 = vector.load %arg4[%c1_11, %c0_12, %c0_13] : memref<2x16x256xf32, #tpu.memory_space<vmem>>, vector<1x16x256xf32>
    %20 = vector.shape_cast %19 : vector<1x16x256xf32> to vector<16x256xf32>
    %21 = vector.shape_cast %18 : vector<16x256xf32> to vector<1x16x256xf32>
    tpu.vector_store %arg4[%c1_11, %c0_12, %c0_13], %21 {strides = array<i32>} : memref<2x16x256xf32, #tpu.memory_space<vmem>>, vector<1x16x256xf32>,
    return
  }
  func.func @transform_0(%arg0: i32) -> (i32, i32, i32) {
    %c0_i32 = arith.constant 0 : i32
    %c0_i32_0 = arith.constant 0 : i32
    %c0_i32_1 = arith.constant 0 : i32
    return %arg0, %c0_i32, %c0_i32_0 : i32, i32, i32
  }
  func.func @transform_1(%arg0: i32) -> (i32, i32) {
    %c0_i32 = arith.constant 0 : i32
    %c0_i32_0 = arith.constant 0 : i32
    %c0_i32_1 = arith.constant 0 : i32
    return %c0_i32, %c0_i32_0 : i32, i32
  }
  func.func @transform_2(%arg0: i32) -> (i32, i32) {
    %c0_i32 = arith.constant 0 : i32
    %c0_i32_0 = arith.constant 0 : i32
    %c0_i32_1 = arith.constant 0 : i32
    return %c0_i32, %c0_i32_0 : i32, i32
  }
  func.func @transform_3(%arg0: i32) -> (i32, i32, i32) {
    %c0_i32 = arith.constant 0 : i32
    %c0_i32_0 = arith.constant 0 : i32
    %c0_i32_1 = arith.constant 0 : i32
    return %arg0, %c0_i32, %c0_i32_0 : i32, i32, i32
  }
}

</mosaic_0001>

<bundles_post_ra>
// kernel: tpu_custom_call.1
= control target key start
LH: loop header
LB: loop body
LE: loop exit
PB: predicated region body
PF: predicated region fallthrough
CT: control target
= control target key end

     0   :  { %v383_v7 = vmov 0   ;;  %s566_s0 = inlined_call_operand.vmem [shape: f32[2,128,16], index: 0, kind: input, shape index: {}]   ;;  %s567_s1 = inlined_call_operand.vmem [shape: bf16[128,256], index: 1, kind: input, shape index: {}]   ;;  %s568_s2 = inlined_call_operand.vmem [shape: f32[1,256], index: 2, kind: input, shape index: {}]   ;;  %s569_s3 = inlined_call_operand.hbm [shape: f32[2,16,256], index: 3, kind: output, shape index: {}]  }
   0x1   :  { %v283_v0 = vld [vmem:[%s566_s0 + $0x80] sm:$0xff]  ;;  %v284_v1 = vld [vmem:[%s566_s0 + $0x88] sm:$0xff]  ;;  %v285_v5 = vld [vmem:[%s566_s0 + $0x90] sm:$0xff]  ;;  %237 = vmatprep.mubr.bf16.mxu0 %v383_v7  ;;  %247 = vmatprep.mubr.bf16.mxu1 %v383_v7 }
   0x2   :  { %v16_v2 = vld [vmem:[%s566_s0] sm:$0xff]  ;;  %v73_v3 = vpack.c.bf16 %v284_v1, %v283_v0  ;;  %v17_v4 = vld [vmem:[%s566_s0 + $0x8] sm:$0xff]  ;;  %v286_v6 = vld [vmem:[%s566_s0 + $0x98] sm:$0xff] }
   0x3   :  { %v32_v8 = vpack.c.bf16 %v17_v4, %v16_v2  ;;  %v18_v9 = vld [vmem:[%s566_s0 + $0x10] sm:$0xff]  ;;  %v19_v10 = vld [vmem:[%s566_s0 + $0x18] sm:$0xff]  ;;  %v74_v11 = vpack.c.bf16 %v286_v6, %v285_v5  ;;  %v287_v13 = vld [vmem:[%s566_s0 + $0xa0] sm:$0xff] }
   0x4   :  { %81 = vxpose.xlu1.c.b16.start [1/8] (narrow) %v73_v3, 16  ;;  %v33_v12 = vpack.c.bf16 %v19_v10, %v18_v9  ;;  %v288_v14 = vld [vmem:[%s566_s0 + $0xa8] sm:$0xff]  ;;  %v20_v15 = vld [vmem:[%s566_s0 + $0x20] sm:$0xff]  ;;  %v289_v19 = vld [vmem:[%s566_s0 + $0xb0] sm:$0xff] }
   0x5   :  { %40 = vxpose.xlu0.c.b16.start [1/8] (narrow) %v32_v8, 16  ;;  %v21_v16 = vld [vmem:[%s566_s0 + $0x28] sm:$0xff]  ;;  %v75_v17 = vpack.c.bf16 %v288_v14, %v287_v13  ;;  %v290_v20 = vld [vmem:[%s566_s0 + $0xb8] sm:$0xff]  ;;  %v22_v21 = vld [vmem:[%s566_s0 + $0x30] sm:$0xff] }
   0x6   :  { %v34_v18 = vpack.c.bf16 %v21_v16, %v20_v15  ;;  %v23_v22 = vld [vmem:[%s566_s0 + $0x38] sm:$0xff]  ;;  %v291_v23 = vld [vmem:[%s566_s0 + $0xc0] sm:$0xff]  ;;  %v292_v24 = vld [vmem:[%s566_s0 + $0xc8] sm:$0xff]  ;;  %v76_v25 = vpack.c.bf16 %v290_v20, %v289_v19 }
   0x7   :  { %v24_v26 = vld [vmem:[%s566_s0 + $0x40] sm:$0xff]  ;;  %v35_v29 = vpack.c.bf16 %v23_v22, %v22_v21  ;;  %v338_v30 = vld [vmem:[%s567_s1 + $0x14] ss:$8 sps:$4 sm:$0xff]   ;;  %v25_v31 = vld [vmem:[%s566_s0 + $0x48] sm:$0xff]  ;;  %v77_v34 = vpack.c.bf16 %v292_v24, %v291_v23 }
   0x8   :  { %82 = vxpose.xlu1.c.b16.cont [2/8] (narrow) %v74_v11, 16  ;;  %v335_v27 = vld [vmem:[%s567_s1 + $0x4] ss:$8 sps:$4 sm:$0xff]   ;;  %v337_v28 = vld [vmem:[%s567_s1] ss:$8 sps:$4 sm:$0xff]   ;;  %v293_v32 = vld [vmem:[%s566_s0 + $0xd0] sm:$0xff]  ;;  %v36_v37 = vpack.c.bf16 %v25_v31, %v24_v26 }
   0x9   :  { %41 = vxpose.xlu0.c.b16.cont [2/8] (narrow) %v33_v12, 16  ;;  %205 = vmatprep.subr.bf16.mxu0 %v335_v27  ;;  %v340_v33 = vld [vmem:[%s567_s1 + $0x10] ss:$8 sps:$4 sm:$0xff]   ;;  %v341_v36 = vld [vmem:[%s567_s1 + $0x24] ss:$8 sps:$4 sm:$0xff]  }
   0xa   :  { %315 = vmatprep.subr.bf16.mxu1 %v335_v27  ;;  %206 = vmatpush1.bf16.msra.mxu0 %v337_v28  ;;  %v294_v35 = vld [vmem:[%s566_s0 + $0xd8] sm:$0xff]  ;;  %v26_v38 = vld [vmem:[%s566_s0 + $0x50] sm:$0xff]  ;;  %v343_v40 = vld [vmem:[%s567_s1 + $0x20] ss:$8 sps:$4 sm:$0xff]  }
   0xb   :  { %323 = vmatpush1.bf16.msra.mxu1 %v337_v28  ;;  %207 = vmatprep.subr.bf16.mxu0 %v338_v30  ;;  %v27_v39 = vld [vmem:[%s566_s0 + $0x58] sm:$0xff]  ;;  %v78_v41 = vpack.c.bf16 %v294_v35, %v293_v32  ;;  %v295_v42 = vld [vmem:[%s566_s0 + $0xe0] sm:$0xff]  ;;  %v296_v45 = vld [vmem:[%s566_s0 + $0xe8] sm:$0xff] }
   0xc   :  { %83 = vxpose.xlu1.c.b16.cont [3/8] (narrow) %v75_v17, 16  ;;  %316 = vmatprep.subr.bf16.mxu1 %v338_v30  ;;  %v344_v43 = vld [vmem:[%s567_s1 + $0x34] ss:$8 sps:$4 sm:$0xff]   ;;  %v37_v44 = vpack.c.bf16 %v27_v39, %v26_v38  ;;  %v28_v46 = vld [vmem:[%s566_s0 + $0x60] sm:$0xff]  ;;  %v29_v47 = vld [vmem:[%s566_s0 + $0x68] sm:$0xff] }
   0xd   :  { %42 = vxpose.xlu0.c.b16.cont [3/8] (narrow) %v34_v18, 16 }
   0xe   :  { %208 = vmatpush1.bf16.msra.mxu0 %v340_v33 }
   0xf   :  { %324 = vmatpush1.bf16.msra.mxu1 %v340_v33  ;;  %209 = vmatprep.subr.bf16.mxu0 %v341_v36 }
  0x10   :  { %84 = vxpose.xlu1.c.b16.cont [4/8] (narrow) %v76_v25, 16  ;;  %317 = vmatprep.subr.bf16.mxu1 %v341_v36 }
  0x11   :  { %43 = vxpose.xlu0.c.b16.cont [4/8] (narrow) %v35_v29, 16 }
  0x14   :  { %85 = vxpose.xlu1.c.b16.cont [5/8] (narrow) %v77_v34, 16 }
  0x15   :  { %44 = vxpose.xlu0.c.b16.cont [5/8] (narrow) %v36_v37, 16 }
  0x16   :  { %8 = vsyncpa [#allocation3], 0  ;;  %210 = vmatpush1.bf16.msra.mxu0 %v343_v40  ;;  %325 = vmatpush1.bf16.msra.mxu1 %v343_v40  ;;  %v346_v48 = vld [vmem:[%s567_s1 + $0x30] ss:$8 sps:$4 sm:$0xff]   ;;  %v79_v49 = vpack.c.bf16 %v296_v45, %v295_v42  ;;  %v347_v50 = vld [vmem:[%s567_s1 + $0x44] ss:$8 sps:$4 sm:$0xff]   ;;  %v38_v51 = vpack.c.bf16 %v29_v47, %v28_v46  ;;  %v115_v3 = vlaneseq }
  0x17   :  { %211 = vmatprep.subr.bf16.mxu0 %v344_v43  ;;  %v297_v52 = vld [vmem:[%s566_s0 + $0xf0] sm:$0xff]  ;;  %v298_v53 = vld [vmem:[%s566_s0 + $0xf8] sm:$0xff]  ;;  %318 = vmatprep.subr.bf16.mxu1 %v344_v43  ;;  %v349_v56 = vld [vmem:[%s567_s1 + $0x40] ss:$8 sps:$4 sm:$0xff]  }
  0x18   :  { %86 = vxpose.xlu1.c.b16.cont [6/8] (narrow) %v78_v41, 16  ;;  %v30_v54 = vld [vmem:[%s566_s0 + $0x70] sm:$0xff]  ;;  %v31_v55 = vld [vmem:[%s566_s0 + $0x78] sm:$0xff]  ;;  %v80_v57 = vpack.c.bf16 %v298_v53, %v297_v52  ;;  %v353_v61 = vld [vmem:[%s567_s1 + $0x64] ss:$8 sps:$4 sm:$0xff]   ;;  %v116_v4 = vshrl.u32 %v115_v3, 7 }
  0x19   :  { %45 = vxpose.xlu0.c.b16.cont [6/8] (narrow) %v37_v44, 16  ;;  %v350_v58 = vld [vmem:[%s567_s1 + $0x54] ss:$8 sps:$4 sm:$0xff]   ;;  %v39_v59 = vpack.c.bf16 %v31_v55, %v30_v54  ;;  %v352_v60 = vld [vmem:[%s567_s1 + $0x50] ss:$8 sps:$4 sm:$0xff]  }
  0x1a   :  { %212 = vmatpush1.bf16.msra.mxu0 %v346_v48  ;;  %326 = vmatpush1.bf16.msra.mxu1 %v346_v48  ;;  %v355_v62 = vld [vmem:[%s567_s1 + $0x60] ss:$8 sps:$4 sm:$0xff]   ;;  %v356_v63 = vld [vmem:[%s567_s1 + $0x74] ss:$8 sps:$4 sm:$0xff]   ;;  %v358_v0 = vld [vmem:[%s567_s1 + $0x70] ss:$8 sps:$4 sm:$0xff]  }
  0x1b   :  { %213 = vmatprep.subr.bf16.mxu0 %v347_v50  ;;  %319 = vmatprep.subr.bf16.mxu1 %v347_v50  ;;  %v117_v5 = vsub.s32 0, %v116_v4  ;;  %v113_v6 = vld [vmem:[%s568_s2] sm:$0x3]  ;;  %v121_v7 = vsub.s32 1, %v116_v4  ;;  %s384_s1 = smov [#allocation2]  }
  0x1c   :  { %87 = vxpose.xlu1.c.b16.cont [7/8] (narrow) %v79_v49, 16  ;;  %s272_s28 = sshll.u32 %s384_s1, 4  ;;  %s273_s28 = int_to_ptr.vmem [resolvable:$true] %s272_s28 }
  0x1d   :  { %46 = vxpose.xlu0.c.b16.cont [7/8] (narrow) %v38_v51, 16  ;;  %v118_v8 = vrot.slane %v113_v6, %v117_v5  ;;  %v122_v9 = vrot.slane %v113_v6, %v121_v7  ;;  %s359_s2 = scalar_lea.vmem %s273_s28, 1024  ;;  %p364_p1 = scmp.lt.s32.totalorder %s273_s28, %s273_s28 }
  0x1e   :  { %214 = vmatpush1.bf16.msra.mxu0 %v349_v56  ;;  %327 = vmatpush1.bf16.msra.mxu1 %v349_v56  ;;  %p360_p0 = scmp.ne.s32.totalorder %s273_s28, %s359_s2  ;;  %p365_p2 = scmp.lt.s32.totalorder %s359_s2, %s359_s2 }
  0x1f   :  { %215 = vmatprep.subr.bf16.mxu0 %v350_v58  ;;  %320 = vmatprep.subr.bf16.mxu1 %v350_v58 }
  0x20   :  { %88 = vxpose.xlu1.c.b16.end [8/8] (narrow) %v80_v57, 16  ;;  %p366_p3 = por %p365_p2, %p364_p1 }
  0x21   :  { %47 = vxpose.xlu0.c.b16.end [8/8] (narrow) %v39_v59, 16 }
  0x22   :  { %216 = vmatpush1.bf16.msra.mxu0 %v352_v60  ;;  %328 = vmatpush1.bf16.msra.mxu1 %v352_v60  ;;  %p367_p4 = pnand %p366_p3, %p360_p0 }
  0x23   :  { %217 = vmatprep.subr.bf16.mxu0 %v353_v61  ;;  %321 = vmatprep.subr.bf16.mxu1 %v353_v61 }
  0x26   :  { %218 = vmatpush1.bf16.msra.mxu0 %v355_v62  ;;  %329 = vmatpush1.bf16.msra.mxu1 %v355_v62 }
  0x27   :  { %219 = vmatprep.subr.bf16.mxu0 %v356_v63  ;;  %322 = vmatprep.subr.bf16.mxu1 %v356_v63 }
  0x2a   :  { %220 = vmatpush1.bf16.msra.mxu0 %v358_v0  ;;  %330 = vmatpush1.bf16.msra.mxu1 %v358_v0 }
  0x6a   :  { %v89_v1 = vpop.trf.xlu1 }
  0x6b   :  { %v48_v2 = vpop.trf.xlu0  ;;  %248 = vmatmul.mubr.bf16.vlgmr.msra.gmra.mrb[0].mxu1 %v89_v1 }
  0x6c   :  { %238 = vmatmul.mubr.bf16.vlgmr.msra.gmra.mrb[0].mxu0 %v48_v2 }
 0x13e   :  { %v249_v10 = vpop.f32.mrb[0].mxu1 }
 0x13f   :  { %v239_v11 = vpop.f32.mrb[0].mxu0  ;;  %v250_v12 = vadd.f32 %v249_v10, %v118_v8  ;;  %v251_v13 = vpop.f32.mrb[1].mxu1 }
 0x140   :  { %v240_v14 = vadd.f32 %v239_v11, %v118_v8  ;;  %v241_v15 = vpop.f32.mrb[1].mxu0  ;;  %v252_v16 = vadd.f32 %v251_v13, %v122_v9  ;;  %v253_v17 = vpop.f32.mrb[2].mxu1 }
 0x141   :  { %263 = vst [vmem:[#allocation2 + $0x20] sm:$0xff] %v250_v12  ;;  %v242_v18 = vadd.f32 %v241_v15, %v122_v9  ;;  %v243_v19 = vpop.f32.mrb[2].mxu0  ;;  %v254_v20 = vadd.f32 %v253_v17, %v118_v8  ;;  %v255_v21 = vpop.f32.mrb[3].mxu1 }
 0x142   :  { %258 = vst [vmem:[#allocation2] sm:$0xff] %v240_v14  ;;  %264 = vst [vmem:[#allocation2 + $0x28] sm:$0xff] %v252_v16  ;;  %v244_v22 = vadd.f32 %v243_v19, %v118_v8  ;;  %v245_v23 = vpop.f32.mrb[3].mxu0  ;;  %v256_v24 = vadd.f32 %v255_v21, %v122_v9 }
 0x143   :  { %259 = vst [vmem:[#allocation2 + $0x8] sm:$0xff] %v242_v18  ;;  %265 = vst [vmem:[#allocation2 + $0x30] sm:$0xff] %v254_v20  ;;  %v246_v25 = vadd.f32 %v245_v23, %v122_v9 }
 0x144   :  { %260 = vst [vmem:[#allocation2 + $0x10] sm:$0xff] %v244_v22  ;;  %266 = vst [vmem:[#allocation2 + $0x38] sm:$0xff] %v256_v24 }
 0x145   :  { %261 = vst [vmem:[#allocation2 + $0x18] sm:$0xff] %v246_v25 }
 0x146   :  { %370 = shalt.err (!%p367_p4)
}
 0x147   :  { %s371_s4 = scalar_lea.hbm %s569_s3, 1024 }
 0x148   :  { %p372_p5 = scmp.ne.s32.totalorder %s569_s3, %s371_s4  ;;  %p375_p6 = scmp.lt.u32.totalorder %s371_s4, %s569_s3 }
 0x14a   :  { %p377_p7 = pnand %p375_p6, %p372_p5 }
 0x14c   :  { %380 = shalt.err (!%p377_p7)
}
 0x14d   :  { %s385_s9 = smov 256   ;;  %s386_s10 = smov 16  }
 0x14e   :  { %278 = dma.vmem_to_hbm [thread:$0]  %s273_s28, 1024, %s569_s3, [#allocation3], %s385_s9, %s385_s9, %s386_s10  }
 0x14f   :  { %381 = dma.done.wait [#allocation3], 1024  }
 0x150   :  { %382 = vsyncadd [#allocation3], 4294966272 }
 0x151   :  { %282 = vsyncpa [#allocation3], 1 }

</bundles_post_ra>
